<compile_context>
chip_gen: v7x
topology: tpu7x:2x2x1
jax: 0.10.0
libtpu: 0.0.40
codegen_flags: <defaults>
</compile_context>

<pallas_src>
import jax
import jax.numpy as jnp
from jax.experimental import pallas as pl
from jax.experimental.pallas import tpu as pltpu  # noqa: F401  (kept for CompilerParams if tiling is added later)


def _dual_head_kernel(xf_ref, xo_ref, wf_ref, wo_ref, bf_ref, bo_ref,
                      yf_ref, yo_ref):
    # xf/xo: (B, D)   wf/wo: (D, C)   bf/bo: (1, C)   yf/yo: (B, C)
    yf = jnp.dot(xf_ref[...], wf_ref[...], preferred_element_type=jnp.float32)
    yf_ref[...] = (yf + bf_ref[...]).astype(yf_ref.dtype)
    yo = jnp.dot(xo_ref[...], wo_ref[...], preferred_element_type=jnp.float32)
    yo_ref[...] = (yo + bo_ref[...]).astype(yo_ref.dtype)


def classifier_retina_forward(mu_f, mu_o, params):
    """Pallas equivalent of classifier_retina.forward: returns (y_f, y_o).

    mu_f, mu_o : (B, D) float32 latent means
    params     : dict with pre-transposed weights fundus_w_t/oct_w_t (D, C)
                 and pre-reshaped biases fundus_b/oct_b (1, C)
    """
    B, D = mu_f.shape
    assert mu_o.shape == (B, D), "heads are fused; latents must share (B, D)"
    wf, wo = params["fundus_w_t"], params["oct_w_t"]
    bf, bo = params["fundus_b"], params["oct_b"]
    assert wf.shape == wo.shape and bf.shape == bo.shape, \
        "fused heads require identical (latent_dim, n_classes)"
    assert wf.shape[0] == D
    C = wf.shape[1]

    y_f, y_o = pl.pallas_call(
        _dual_head_kernel,
        out_shape=(jax.ShapeDtypeStruct((B, C), mu_f.dtype),
                   jax.ShapeDtypeStruct((B, C), mu_o.dtype)),
    )(mu_f, mu_o, wf, wo, bf, bo)
    return y_f, y_o


def init_params(key, latent_dim, n_classes):
    """One-time parameter prep: transpose weights to (D, C), biases to (1, C).

    Matches PyTorch nn.Linear init (weight shape (n_classes, latent_dim)).
    All layout work happens here so the forward pass is a single dispatch.
    """
    kf_w, kf_b, ko_w, ko_b = jax.random.split(key, 4)
    scale = 1.0 / jnp.sqrt(latent_dim)
    fundus_w = jax.random.uniform(kf_w, (n_classes, latent_dim),
                                  minval=-scale, maxval=scale, dtype=jnp.float32)
    fundus_b = jax.random.uniform(kf_b, (n_classes,),
                                  minval=-scale, maxval=scale, dtype=jnp.float32)
    oct_w = jax.random.uniform(ko_w, (n_classes, latent_dim),
                               minval=-scale, maxval=scale, dtype=jnp.float32)
    oct_b = jax.random.uniform(ko_b, (n_classes,),
                               minval=-scale, maxval=scale, dtype=jnp.float32)
    return {
        "fundus_w_t": fundus_w.T,                 # (D, C)
        "fundus_b": fundus_b.reshape(1, n_classes),
        "oct_w_t": oct_w.T,                       # (D, C)
        "oct_b": oct_b.reshape(1, n_classes),
    }


if __name__ == "__main__":
    key = jax.random.PRNGKey(0)
    k_mu_f, k_mu_o, k_params = jax.random.split(key, 3)

    batch = 8
    latent_dim = 32
    n_classes = 8

    mu_f = jax.random.normal(k_mu_f, (batch, latent_dim), dtype=jnp.float32)
    mu_o = jax.random.normal(k_mu_o, (batch, latent_dim), dtype=jnp.float32)
    params = init_params(k_params, latent_dim, n_classes)

    y_f, y_o = classifier_retina_forward(mu_f, mu_o, params)
    jax.block_until_ready((y_f, y_o))

    # Pure-JAX reference check (same semantics as PyTorch nn.Linear).
    y_f_ref = mu_f @ params["fundus_w_t"] + params["fundus_b"]
    y_o_ref = mu_o @ params["oct_w_t"] + params["oct_b"]
    assert y_f.shape == (batch, n_classes) and y_o.shape == (batch, n_classes)
    assert jnp.allclose(y_f, y_f_ref, atol=1e-5), "fundus head mismatch"
    assert jnp.allclose(y_o, y_o_ref, atol=1e-5), "oct head mismatch"

    print("KERNEL_OK")
</pallas_src>

<mosaic_0001>
module attributes {stable_mosaic.version = 11 : i64} {
  func.func @_dual_head_kernel(%arg0: memref<8x32xf32, #tpu.memory_space<vmem>>, %arg1: memref<8x32xf32, #tpu.memory_space<vmem>>, %arg2: memref<32x8xf32, #tpu.memory_space<vmem>>, %arg3: memref<32x8xf32, #tpu.memory_space<vmem>>, %arg4: memref<1x8xf32, #tpu.memory_space<vmem>>, %arg5: memref<1x8xf32, #tpu.memory_space<vmem>>, %arg6: memref<8x8xf32, #tpu.memory_space<vmem>>, %arg7: memref<8x8xf32, #tpu.memory_space<vmem>>) attributes {dimension_semantics = [], scalar_prefetch = 0 : i64, scratch_operands = 0 : i64, tpu.core_type = #tpu.core_type<tc>} {
    %c0 = arith.constant 0 : index
    %c0_0 = arith.constant 0 : index
    %0 = vector.load %arg0[%c0, %c0_0] : memref<8x32xf32, #tpu.memory_space<vmem>>, vector<8x32xf32>
    %c0_1 = arith.constant 0 : index
    %c0_2 = arith.constant 0 : index
    %1 = vector.load %arg2[%c0_1, %c0_2] : memref<32x8xf32, #tpu.memory_space<vmem>>, vector<32x8xf32>
    %cst = arith.constant dense<0.000000e+00> : vector<8x8xf32>
    %2 = tpu.matmul %0, %1, %cst {dimension_numbers = #tpu.dot_dimension_numbers<[1], [0], [0], [1], [0, 0, 1, 1], [], []>} : vector<8x32xf32>, vector<32x8xf32>, vector<8x8xf32> -> vector<8x8xf32>
    %c0_3 = arith.constant 0 : index
    %c0_4 = arith.constant 0 : index
    %3 = vector.load %arg4[%c0_3, %c0_4] : memref<1x8xf32, #tpu.memory_space<vmem>>, vector<1x8xf32>
    %4 = vector.broadcast %3 : vector<1x8xf32> to vector<8x8xf32>
    %5 = arith.addf %2, %4 : vector<8x8xf32>
    %c0_5 = arith.constant 0 : index
    %c0_6 = arith.constant 0 : index
    %6 = vector.load %arg6[%c0_5, %c0_6] : memref<8x8xf32, #tpu.memory_space<vmem>>, vector<8x8xf32>
    tpu.vector_store %arg6[%c0_5, %c0_6], %5 {strides = array<i32>} : memref<8x8xf32, #tpu.memory_space<vmem>>, vector<8x8xf32>,
    %c0_7 = arith.constant 0 : index
    %c0_8 = arith.constant 0 : index
    %7 = vector.load %arg1[%c0_7, %c0_8] : memref<8x32xf32, #tpu.memory_space<vmem>>, vector<8x32xf32>
    %c0_9 = arith.constant 0 : index
    %c0_10 = arith.constant 0 : index
    %8 = vector.load %arg3[%c0_9, %c0_10] : memref<32x8xf32, #tpu.memory_space<vmem>>, vector<32x8xf32>
    %cst_11 = arith.constant dense<0.000000e+00> : vector<8x8xf32>
    %9 = tpu.matmul %7, %8, %cst_11 {dimension_numbers = #tpu.dot_dimension_numbers<[1], [0], [0], [1], [0, 0, 1, 1], [], []>} : vector<8x32xf32>, vector<32x8xf32>, vector<8x8xf32> -> vector<8x8xf32>
    %c0_12 = arith.constant 0 : index
    %c0_13 = arith.constant 0 : index
    %10 = vector.load %arg5[%c0_12, %c0_13] : memref<1x8xf32, #tpu.memory_space<vmem>>, vector<1x8xf32>
    %11 = vector.broadcast %10 : vector<1x8xf32> to vector<8x8xf32>
    %12 = arith.addf %9, %11 : vector<8x8xf32>
    %c0_14 = arith.constant 0 : index
    %c0_15 = arith.constant 0 : index
    %13 = vector.load %arg7[%c0_14, %c0_15] : memref<8x8xf32, #tpu.memory_space<vmem>>, vector<8x8xf32>
    tpu.vector_store %arg7[%c0_14, %c0_15], %12 {strides = array<i32>} : memref<8x8xf32, #tpu.memory_space<vmem>>, vector<8x8xf32>,
    return
  }
}

</mosaic_0001>

<bundles_post_ra>
// kernel: tpu_custom_call.1
= control target key start
LH: loop header
LB: loop body
LE: loop exit
PB: predicated region body
PF: predicated region fallthrough
CT: control target
= control target key end

     0   :  { %13 = vsyncpa [#allocation3], 0  ;;  %v330_v3 = vmov 0.0|0.0   ;;  %vm331_vm0 = vmmov 0   ;;  %v332_v11 = vmov 0.0   ;;  %s437_s0 = inlined_call_operand.vmem [shape: f32[8,32], index: 0, kind: input, shape index: {}]   ;;  %s438_s1 = inlined_call_operand.vmem [shape: f32[8,32], index: 1, kind: input, shape index: {}]   ;;  %s439_s2 = inlined_call_operand.vmem [shape: f32[32,8], index: 2, kind: input, shape index: {}]   ;;  %s440_s3 = inlined_call_operand.vmem [shape: f32[32,8], index: 3, kind: input, shape index: {}]   ;;  %s441_s4 = inlined_call_operand.vmem [shape: f32[1,8], index: 4, kind: input, shape index: {}]   ;;  %s442_s5 = inlined_call_operand.vmem [shape: f32[1,8], index: 5, kind: input, shape index: {}]   ;;  %s443_s6 = inlined_call_operand.hbm [shape: f32[8,8], index: 6, kind: output, shape index: {0}]   ;;  %s444_s7 = inlined_call_operand.hbm [shape: f32[8,8], index: 7, kind: output, shape index: {1}]  }
   0x1   :  { %v28_v0 = vld [vmem:[%s439_s2] sm:$0xff]  ;;  %v29_v1 = vld [vmem:[%s439_s2 + $0x8] sm:$0xff]  ;;  %265 = vmatprep.subr.bf16.mxu0 %v330_v3  ;;  %271 = vmatprep.subr.bf16.mxu1 %v330_v3  ;;  %v30_v6 = vld [vmem:[%s439_s2 + $0x10] sm:$0xff] }
   0x2   :  { %v116_v2 = vld [vmem:[%s440_s3] sm:$0xff]  ;;  %v266_v4 = vpack.c.bf16 %v29_v1, %v28_v0  ;;  %v117_v5 = vld [vmem:[%s440_s3 + $0x8] sm:$0xff]  ;;  %v31_v7 = vld [vmem:[%s439_s2 + $0x18] sm:$0xff]  ;;  %251 = vmatprep.mubr.msk.f32.mxu0 %vm331_vm0, %v332_v11  ;;  %262 = vmatprep.mubr.msk.f32.mxu1 %vm331_vm0, %v332_v11 }
   0x3   :  { %v272_v8 = vpack.c.bf16 %v117_v5, %v116_v2  ;;  %v118_v9 = vld [vmem:[%s440_s3 + $0x10] sm:$0xff]  ;;  %v119_v10 = vld [vmem:[%s440_s3 + $0x18] sm:$0xff]  ;;  %v269_v12 = vpack.c.bf16 %v31_v7, %v30_v6 }
   0x4   :  { %267 = vmatpush3.bf16.msra.mxu0 %v266_v4 }
   0x5   :  { %14 = vsyncpa [#allocation5], 0  ;;  %273 = vmatpush3.bf16.msra.mxu1 %v272_v8  ;;  %268 = vmatprep.subr.bf16.mxu0 %v330_v3  ;;  %v275_v13 = vpack.c.bf16 %v119_v10, %v118_v9  ;;  %v27_v14 = vld [vmem:[%s437_s0] sm:$0xff]  ;;  %vm39_vm1 = vcmask 261120   ;;  %s333_s21 = smov [#allocation2]   ;;  %s334_s25 = smov [#allocation4]  }
   0x6   :  { %274 = vmatprep.subr.bf16.mxu1 %v330_v3  ;;  %v115_v15 = vld [vmem:[%s438_s1] sm:$0xff]  ;;  %s207_s22 = sshll.u32 %s333_s21, 4  ;;  %s217_s0 = sshll.u32 %s334_s25, 4  ;;  %vm113_vm2 = vcmask 64512   ;;  %s208_s22 = int_to_ptr.vmem [resolvable:$true] %s207_s22  ;;  %s218_s0 = int_to_ptr.vmem [resolvable:$true] %s217_s0 }
   0x7   :  { %v229_v16 = vld [vmem:[%s441_s4] ss:$0 sm:$0xff]  ;;  %s282_s1 = scalar_lea.vmem %s208_s22, 128  ;;  %p287_p1 = scmp.lt.s32.totalorder %s208_s22, %s208_s22 }
   0x8   :  { %270 = vmatpush3.bf16.msra.mxu0 %v269_v12  ;;  %v231_v17 = vld [vmem:[%s442_s5] ss:$0 sm:$0xff]  ;;  %p283_p0 = scmp.ne.s32.totalorder %s208_s22, %s282_s1  ;;  %p288_p2 = scmp.lt.s32.totalorder %s282_s1, %s282_s1 }
   0x9   :  { %276 = vmatpush3.bf16.msra.mxu1 %v275_v13 }
   0xa   :  { %p289_p3 = por %p288_p2, %p287_p1 }
   0xb   :  { %252 = vmatmul.mubr.msk.f32.vlgmr.msra.gmra.mrb[0].mxu0 %vm39_vm1, %v27_v14 }
   0xc   :  { %263 = vmatmul.mubr.msk.f32.vlgmr.msra.gmra.mrb[0].mxu1 %vm39_vm1, %v115_v15  ;;  %p290_p4 = pnand %p289_p3, %p283_p0 }
  0xde   :  { %v109_v18 = vpop.f32.mrb[0].mxu0 }
  0xdf   :  { %v110_v19 = vadd.f32 %v229_v16, %v109_v18  ;;  %v196_v20 = vpop.f32.mrb[0].mxu1  ;;  %v253_v21 = vpop.f32.mrb[1].mxu0 }
  0xe0   :  { %v197_v22 = vadd.f32 %v231_v17, %v196_v20  ;;  %v264_v23 = vpop.f32.mrb[1].mxu1 }
  0xe1   :  { %114 = vst.msk [vmem:[#allocation2] sm:$0xff] %vm113_vm2, %v110_v19 }
  0xe2   :  { %293 = shalt.err (!%p290_p4)
}
  0xe3   :  { %s294_s26 = scalar_lea.hbm %s443_s6, 128 }
  0xe4   :  { %p295_p5 = scmp.ne.s32.totalorder %s443_s6, %s294_s26  ;;  %p298_p6 = scmp.lt.u32.totalorder %s294_s26, %s443_s6 }
  0xe6   :  { %p300_p7 = pnand %p298_p6, %p295_p5 }
  0xe8   :  { %303 = shalt.err (!%p300_p7)
}
  0xe9   :  { %210 = dma.vmem_to_hbm [thread:$0]  %s208_s22, 128, %s443_s6, [#allocation3]   ;;  %200 = vst.msk [vmem:[#allocation4] sm:$0xff] %vm113_vm2, %v197_v22 }
  0xea   :  { %s304_s10 = scalar_lea.vmem %s218_s0, 128  ;;  %p309_p9 = scmp.lt.s32.totalorder %s218_s0, %s218_s0 }
  0xeb   :  { %p305_p8 = scmp.ne.s32.totalorder %s218_s0, %s304_s10  ;;  %p310_p10 = scmp.lt.s32.totalorder %s304_s10, %s304_s10 }
  0xed   :  { %p311_p11 = por %p310_p10, %p309_p9 }
  0xef   :  { %p312_p12 = pnand %p311_p11, %p305_p8 }
  0xf1   :  { %315 = shalt.err (!%p312_p12)
}
  0xf2   :  { %s316_s13 = scalar_lea.hbm %s444_s7, 128 }
  0xf3   :  { %p317_p13 = scmp.ne.s32.totalorder %s444_s7, %s316_s13  ;;  %p320_p0 = scmp.lt.u32.totalorder %s316_s13, %s444_s7 }
  0xf5   :  { %p322_p1 = pnand %p320_p0, %p317_p13 }
  0xf7   :  { %325 = shalt.err (!%p322_p1)
}
  0xf8   :  { %220 = dma.vmem_to_hbm [thread:$0]  %s218_s0, 128, %s444_s7, [#allocation5]  }
  0xf9   :  { %326 = dma.done.wait [#allocation3], 128  }
  0xfa   :  { %327 = vsyncadd [#allocation3], 4294967168 }
  0xfb   :  { %328 = dma.done.wait [#allocation5], 128  }
  0xfc   :  { %329 = vsyncadd [#allocation5], 4294967168 }
  0xfd   :  { %227 = vsyncpa [#allocation3], 1 }
  0xfe   :  { %228 = vsyncpa [#allocation5], 1 }

</bundles_post_ra>
